<compile_context>
chip_gen: v7x
topology: tpu7x:2x2x1
jax: 0.10.0
libtpu: 0.0.40
codegen_flags: <defaults>
</compile_context>

<pallas_src>
import math

import jax
import jax.numpy as jnp
from jax.experimental import pallas as pl
from jax.experimental.pallas import tpu as pltpu

IN1, H1, H2, OUT = 10, 10, 10, 4
OUT_PAD = 8            # W3/b3 padded to 8 output rows (sublane-aligned MXU M dim)
_TB_MAX = 32768        # batch columns per grid step (multiple of 128)


def _round_up(n, m):
    return ((n + m - 1) // m) * m


def _pick_tile(B):
    """Batch-tile (lane) width: full array for tiny B, else a multiple of 128,
    capped so large B gets >=2 pipelined grid steps and stays within VMEM."""
    if B <= 128:
        return B                                   # block == full array (no 128 constraint)
    if B <= 4096:
        return _round_up(B, 128)                   # single step; overhead negligible here
    return min(_TB_MAX, _round_up((B + 1) // 2, 128))


def _mlp_kernel(x_ref, w1_ref, b1_ref, w2_ref, b2_ref, w3_ref, b3_ref, o_ref):
    # Batch lives on the 128-lane axis: x is (features, tb), output is (OUT, tb).
    x = x_ref[...]                                                      # (10, tb)

    # ColumnParallelLinear(10,10) (tp=1 -> plain linear) + ReLU
    h = jnp.dot(w1_ref[...], x, preferred_element_type=jnp.float32) + b1_ref[...]
    h = jnp.maximum(h, 0.0)

    # RowParallelLinear(10,10) (tp=1 -> plain linear, Reduce is identity) + ReLU
    h = jnp.dot(w2_ref[...], h, preferred_element_type=jnp.float32) + b2_ref[...]
    h = jnp.maximum(h, 0.0)

    # ColumnParallelLinear(10,4, gather_outputs=True) (tp=1 -> Gather is identity)
    y = jnp.dot(w3_ref[...], h, preferred_element_type=jnp.float32) + b3_ref[...]  # (8, tb)
    o_ref[...] = y[:OUT, :].astype(o_ref.dtype)


@jax.jit
def model_forward(x, packed):
    """x: (B, 10) float32. packed: tuple of 6 param arrays from pack_params()."""
    B = x.shape[0]
    xt = x.T                                  # (10, B): batch onto the lane axis (wrapper glue)
    tb = _pick_tile(B)
    grid = (pl.cdiv(B, tb),)

    out_t = pl.pallas_call(
        _mlp_kernel,
        out_shape=jax.ShapeDtypeStruct((OUT, B), x.dtype),
        grid_spec=pltpu.PrefetchScalarGridSpec(
            num_scalar_prefetch=0,
            grid=grid,
            in_specs=[
                pl.BlockSpec((IN1, tb), lambda i: (0, i)),        # batch-tiled x (lane-dense)
                pl.BlockSpec((H1, IN1), lambda i: (0, 0)),        # W1, resident
                pl.BlockSpec((H1, 1), lambda i: (0, 0)),          # b1, resident
                pl.BlockSpec((H2, H1), lambda i: (0, 0)),         # W2, resident
                pl.BlockSpec((H2, 1), lambda i: (0, 0)),          # b2, resident
                pl.BlockSpec((OUT_PAD, H2), lambda i: (0, 0)),    # W3 (row-padded), resident
                pl.BlockSpec((OUT_PAD, 1), lambda i: (0, 0)),     # b3 (row-padded), resident
            ],
            out_specs=pl.BlockSpec((OUT, tb), lambda i: (0, i)),  # lane-dense output block
        ),
        compiler_params=pltpu.CompilerParams(
            dimension_semantics=("parallel",),
            vmem_limit_bytes=32 * 1024 * 1024,
        ),
        cost_estimate=pl.CostEstimate(
            flops=2 * B * (IN1 * H1 + H1 * H2 + H2 * OUT),
            transcendentals=0,
            bytes_accessed=4 * (B * IN1 + B * OUT
                                + H1 * IN1 + H1 + H2 * H1 + H2 + OUT_PAD * H2 + OUT_PAD),
        ),
    )(xt, *packed)

    return out_t.T                                # (B, 4): back to the module's output layout


def init_params(key):
    """Deterministic init matching the PyTorch module at tp_world_size == 1.

    Linear weights: uniform(-sqrt(1/in_features), +sqrt(1/in_features)); biases zeros.
    Shapes follow PyTorch (out_features, in_features).
    """
    k1, k2, k3 = jax.random.split(key, 3)

    def uni(k, out_f, in_f):
        bound = math.sqrt(1.0 / in_f)
        return jax.random.uniform(
            k, (out_f, in_f), minval=-bound, maxval=bound, dtype=jnp.float32
        )

    return {
        "w1": uni(k1, H1, IN1), "b1": jnp.zeros((H1,), jnp.float32),
        "w2": uni(k2, H2, H1),  "b2": jnp.zeros((H2,), jnp.float32),
        "w3": uni(k3, OUT, H2), "b3": jnp.zeros((OUT,), jnp.float32),
    }


def pack_params(params):
    """One-time layout glue (outside the hot path).

    Weights stay in PyTorch (out, in) layout -- exactly what the batch-on-lanes
    kernel needs (h = W @ x).  Biases become (out, 1) columns that lane-broadcast.
    W3/b3 are zero-padded from 4 to 8 output rows so the final matmul's M dim is
    sublane-aligned; the kernel slices rows [:4] before the store.
    """
    w3_p = jnp.zeros((OUT_PAD, H2), jnp.float32).at[:OUT, :].set(params["w3"])
    b3_p = jnp.zeros((OUT_PAD, 1), jnp.float32).at[:OUT, 0].set(params["b3"])
    return (
        params["w1"], params["b1"].reshape(H1, 1),
        params["w2"], params["b2"].reshape(H2, 1),
        w3_p, b3_p,
    )


def _reference_forward(x, params):
    h = jnp.maximum(x @ params["w1"].T + params["b1"], 0.0)
    h = jnp.maximum(h @ params["w2"].T + params["b2"], 0.0)
    return h @ params["w3"].T + params["b3"]


if __name__ == "__main__":
    key = jax.random.PRNGKey(0)
    pkey, xkey = jax.random.split(key)

    params = init_params(pkey)
    packed = pack_params(params)                               # one-time, outside the hot path
    x = jax.random.normal(xkey, (8, IN1), dtype=jnp.float32)   # batch=8, features=10

    out = jax.block_until_ready(model_forward(x, packed))

    ref = _reference_forward(x, params)
    assert out.shape == (8, OUT)
    # DEFAULT-precision f32 matmuls may take a bf16 MXU pass; allow ~1e-2 slack
    # (values are O(1), so this is well above any layout/indexing bug signal).
    assert jnp.allclose(out, ref, atol=2e-2, rtol=2e-2), float(jnp.max(jnp.abs(out - ref)))

    print("KERNEL_OK")
</pallas_src>

<mosaic_0001>
module attributes {stable_mosaic.version = 11 : i64} {
  func.func @_mlp_kernel(%arg0: i32, %arg1: memref<10x8xf32, #tpu.memory_space<vmem>>, %arg2: memref<10x10xf32, #tpu.memory_space<vmem>>, %arg3: memref<10x1xf32, #tpu.memory_space<vmem>>, %arg4: memref<10x10xf32, #tpu.memory_space<vmem>>, %arg5: memref<10x1xf32, #tpu.memory_space<vmem>>, %arg6: memref<8x10xf32, #tpu.memory_space<vmem>>, %arg7: memref<8x1xf32, #tpu.memory_space<vmem>>, %arg8: memref<4x8xf32, #tpu.memory_space<vmem>>) attributes {dimension_semantics = [#tpu.dimension_semantics<parallel>], iteration_bounds = array<i64: 1>, scalar_prefetch = 0 : i64, scratch_operands = 0 : i64, tpu.core_type = #tpu.core_type<tc>, window_params = [{transform_indices = @transform_0, window_bounds = array<i64: 10, 8>}, {pipeline_mode = #tpu.pipeline_mode<synchronous>, transform_indices = @transform_1, window_bounds = array<i64: 10, 10>}, {pipeline_mode = #tpu.pipeline_mode<synchronous>, transform_indices = @transform_2, window_bounds = array<i64: 10, 1>}, {pipeline_mode = #tpu.pipeline_mode<synchronous>, transform_indices = @transform_3, window_bounds = array<i64: 10, 10>}, {pipeline_mode = #tpu.pipeline_mode<synchronous>, transform_indices = @transform_4, window_bounds = array<i64: 10, 1>}, {pipeline_mode = #tpu.pipeline_mode<synchronous>, transform_indices = @transform_5, window_bounds = array<i64: 8, 10>}, {pipeline_mode = #tpu.pipeline_mode<synchronous>, transform_indices = @transform_6, window_bounds = array<i64: 8, 1>}, {transform_indices = @transform_7, window_bounds = array<i64: 4, 8>}]} {
    %c0 = arith.constant 0 : index
    %c0_0 = arith.constant 0 : index
    %0 = vector.load %arg1[%c0, %c0_0] : memref<10x8xf32, #tpu.memory_space<vmem>>, vector<10x8xf32>
    %c0_1 = arith.constant 0 : index
    %c0_2 = arith.constant 0 : index
    %1 = vector.load %arg2[%c0_1, %c0_2] : memref<10x10xf32, #tpu.memory_space<vmem>>, vector<10x10xf32>
    %cst = arith.constant dense<0.000000e+00> : vector<10x8xf32>
    %2 = tpu.matmul %1, %0, %cst {dimension_numbers = #tpu.dot_dimension_numbers<[1], [0], [0], [1], [0, 0, 1, 1], [], []>} : vector<10x10xf32>, vector<10x8xf32>, vector<10x8xf32> -> vector<10x8xf32>
    %c0_3 = arith.constant 0 : index
    %c0_4 = arith.constant 0 : index
    %3 = vector.load %arg3[%c0_3, %c0_4] : memref<10x1xf32, #tpu.memory_space<vmem>>, vector<10x1xf32>
    %4 = vector.broadcast %3 : vector<10x1xf32> to vector<10x8xf32>
    %5 = arith.addf %2, %4 : vector<10x8xf32>
    %cst_5 = arith.constant 0.000000e+00 : f32
    %6 = vector.broadcast %cst_5 : f32 to vector<10x8xf32>
    %7 = arith.maximumf %5, %6 : vector<10x8xf32>
    %c0_6 = arith.constant 0 : index
    %c0_7 = arith.constant 0 : index
    %8 = vector.load %arg4[%c0_6, %c0_7] : memref<10x10xf32, #tpu.memory_space<vmem>>, vector<10x10xf32>
    %cst_8 = arith.constant dense<0.000000e+00> : vector<10x8xf32>
    %9 = tpu.matmul %8, %7, %cst_8 {dimension_numbers = #tpu.dot_dimension_numbers<[1], [0], [0], [1], [0, 0, 1, 1], [], []>} : vector<10x10xf32>, vector<10x8xf32>, vector<10x8xf32> -> vector<10x8xf32>
    %c0_9 = arith.constant 0 : index
    %c0_10 = arith.constant 0 : index
    %10 = vector.load %arg5[%c0_9, %c0_10] : memref<10x1xf32, #tpu.memory_space<vmem>>, vector<10x1xf32>
    %11 = vector.broadcast %10 : vector<10x1xf32> to vector<10x8xf32>
    %12 = arith.addf %9, %11 : vector<10x8xf32>
    %cst_11 = arith.constant 0.000000e+00 : f32
    %13 = vector.broadcast %cst_11 : f32 to vector<10x8xf32>
    %14 = arith.maximumf %12, %13 : vector<10x8xf32>
    %c0_12 = arith.constant 0 : index
    %c0_13 = arith.constant 0 : index
    %15 = vector.load %arg6[%c0_12, %c0_13] : memref<8x10xf32, #tpu.memory_space<vmem>>, vector<8x10xf32>
    %cst_14 = arith.constant dense<0.000000e+00> : vector<8x8xf32>
    %16 = tpu.matmul %15, %14, %cst_14 {dimension_numbers = #tpu.dot_dimension_numbers<[1], [0], [0], [1], [0, 0, 1, 1], [], []>} : vector<8x10xf32>, vector<10x8xf32>, vector<8x8xf32> -> vector<8x8xf32>
    %c0_15 = arith.constant 0 : index
    %c0_16 = arith.constant 0 : index
    %17 = vector.load %arg7[%c0_15, %c0_16] : memref<8x1xf32, #tpu.memory_space<vmem>>, vector<8x1xf32>
    %18 = vector.broadcast %17 : vector<8x1xf32> to vector<8x8xf32>
    %19 = arith.addf %16, %18 : vector<8x8xf32>
    %20 = vector.extract_strided_slice %19 {offsets = [0, 0], sizes = [4, 8], strides = [1, 1]} : vector<8x8xf32> to vector<4x8xf32>
    %c0_17 = arith.constant 0 : index
    %c0_18 = arith.constant 0 : index
    %21 = vector.load %arg8[%c0_17, %c0_18] : memref<4x8xf32, #tpu.memory_space<vmem>>, vector<4x8xf32>
    tpu.vector_store %arg8[%c0_17, %c0_18], %20 {strides = array<i32>} : memref<4x8xf32, #tpu.memory_space<vmem>>, vector<4x8xf32>,
    return
  }
  func.func @transform_0(%arg0: i32) -> (i32, i32) {
    %c0_i32 = arith.constant 0 : i32
    %c0_i32_0 = arith.constant 0 : i32
    return %c0_i32, %arg0 : i32, i32
  }
  func.func @transform_1(%arg0: i32) -> (i32, i32) {
    %c0_i32 = arith.constant 0 : i32
    %c0_i32_0 = arith.constant 0 : i32
    %c0_i32_1 = arith.constant 0 : i32
    return %c0_i32, %c0_i32_0 : i32, i32
  }
  func.func @transform_2(%arg0: i32) -> (i32, i32) {
    %c0_i32 = arith.constant 0 : i32
    %c0_i32_0 = arith.constant 0 : i32
    %c0_i32_1 = arith.constant 0 : i32
    return %c0_i32, %c0_i32_0 : i32, i32
  }
  func.func @transform_3(%arg0: i32) -> (i32, i32) {
    %c0_i32 = arith.constant 0 : i32
    %c0_i32_0 = arith.constant 0 : i32
    %c0_i32_1 = arith.constant 0 : i32
    return %c0_i32, %c0_i32_0 : i32, i32
  }
  func.func @transform_4(%arg0: i32) -> (i32, i32) {
    %c0_i32 = arith.constant 0 : i32
    %c0_i32_0 = arith.constant 0 : i32
    %c0_i32_1 = arith.constant 0 : i32
    return %c0_i32, %c0_i32_0 : i32, i32
  }
  func.func @transform_5(%arg0: i32) -> (i32, i32) {
    %c0_i32 = arith.constant 0 : i32
    %c0_i32_0 = arith.constant 0 : i32
    %c0_i32_1 = arith.constant 0 : i32
    return %c0_i32, %c0_i32_0 : i32, i32
  }
  func.func @transform_6(%arg0: i32) -> (i32, i32) {
    %c0_i32 = arith.constant 0 : i32
    %c0_i32_0 = arith.constant 0 : i32
    %c0_i32_1 = arith.constant 0 : i32
    return %c0_i32, %c0_i32_0 : i32, i32
  }
  func.func @transform_7(%arg0: i32) -> (i32, i32) {
    %c0_i32 = arith.constant 0 : i32
    %c0_i32_0 = arith.constant 0 : i32
    return %c0_i32, %arg0 : i32, i32
  }
}

</mosaic_0001>

<bundles_post_ra>
// kernel: model_forward.1
= control target key start
LH: loop header
LB: loop body
LE: loop exit
PB: predicated region body
PF: predicated region fallthrough
CT: control target
= control target key end

     0   :  { %vm50_vm0 = vcmask 1041408   ;;  %vm418_vm1 = vmmov 1   ;;  %vm43_vm3 = vcmask 80896   ;;  %v419_v6 = vmov 0   ;;  %s531_s0 = inlined_call_operand.vmem [shape: f32[10,8], index: 0, kind: input, shape index: {}]   ;;  %s532_s1 = inlined_call_operand.vmem [shape: f32[10,10], index: 1, kind: input, shape index: {}]   ;;  %s533_s2 = inlined_call_operand.vmem [shape: f32[10,1], index: 2, kind: input, shape index: {}]   ;;  %s534_s3 = inlined_call_operand.vmem [shape: f32[10,10], index: 3, kind: input, shape index: {}]   ;;  %s535_s4 = inlined_call_operand.vmem [shape: f32[10,1], index: 4, kind: input, shape index: {}]   ;;  %s536_s5 = inlined_call_operand.vmem [shape: f32[8,10], index: 5, kind: input, shape index: {}]   ;;  %s537_s6 = inlined_call_operand.vmem [shape: f32[8,1], index: 6, kind: input, shape index: {}]   ;;  %s538_s7 = inlined_call_operand.hbm [shape: f32[4,8], index: 7, kind: output, shape index: {}]  }
   0x1   :  { %v27_v0 = vld [vmem:[%s531_s0] sm:$0xff]  ;;  %v28_v1 = vld [vmem:[%s531_s0 + $0x8] sm:$0x3]  ;;  %vm473_vm2 = vmpackc.low %vm50_vm0, %vm418_vm1  ;;  %392 = vset.pattern.permute.xlu0 %v419_v6 }
   0x2   :  { %v29_v2 = vld [vmem:[%s532_s1] sm:$0xff]  ;;  %v370_v3 = vpack.c.bf16 %v28_v1, %v27_v0 }
   0x3   :  { %v31_v5 = vld [vmem:[%s533_s2] sm:$0xff]  ;;  %353 = vmatprep.mubr.msk.f32.mxu0 %vm43_vm3, %v29_v2 }
   0x4   :  { %12 = vsyncpa [#allocation3], 0  ;;  %372 = vmatprep.subr.msk.bf16.mxu0 %vm473_vm2, %v370_v3  ;;  %35 = vperm.xlu0 %392, %v31_v5   ;;  %v30_v7 = vld [vmem:[%s532_s1 + $0x8] sm:$0x3]  ;;  %v232_v9 = vld [vmem:[%s537_s6] sm:$0xff]  ;;  %v420_v23 = vmov 0.0|0.0  }
   0x5   :  { %375 = vmatpush3.bf16.msk.msra.mxu0 %vm473_vm2, %v370_v3  ;;  %v32_v8 = vld [vmem:[%s533_s2 + $0x8] sm:$0x3]  ;;  %393 = vset.pattern.permute.xlu1 %v419_v6  ;;  %v131_v10 = vld [vmem:[%s534_s3] sm:$0xff]  ;;  %vm421_vm4 = vmmov 0   ;;  %v422_v24 = vmov 0.0   ;;  %s423_s19 = smov [#allocation2]  }
   0x6   :  { %360 = vmatprep.mubr.msk.f32.mxu1 %vm43_vm3, %v131_v10  ;;  %v133_v11 = vld [vmem:[%s535_s4] sm:$0xff]  ;;  %v134_v12 = vld [vmem:[%s535_s4 + $0x8] sm:$0x3]  ;;  %382 = vmatprep.subr.bf16.mxu0 %v420_v23  ;;  %s322_s20 = sshll.u32 %s423_s19, 4  ;;  %vm314_vm5 = vcmask 60416   ;;  %s323_s20 = int_to_ptr.vmem [resolvable:$true] %s322_s20 }
   0x7   :  { %137 = vperm.xlu1 %393, %v133_v11   ;;  %v132_v22 = vld [vmem:[%s534_s3 + $0x8] sm:$0x3]  ;;  %v231_v34 = vld [vmem:[%s536_s5] sm:$0xff]  ;;  %s394_s21 = scalar_lea.vmem %s323_s20, 64  ;;  %p399_p1 = scmp.lt.s32.totalorder %s323_s20, %s323_s20 }
   0x8   :  { %354 = vmatmul.mubr.msk.f32.vlgmr.msra.gmra.mrb[0].mxu0 %vm43_vm3, %v30_v7  ;;  %40 = vperm.xlu0 %392, %v32_v8   ;;  %p395_p0 = scmp.ne.s32.totalorder %s323_s20, %s394_s21  ;;  %p400_p2 = scmp.lt.s32.totalorder %s394_s21, %s394_s21 }
   0x9   :  { %367 = vmatprep.mubr.msk.f32.mxu0 %vm421_vm4, %v422_v24 }
   0xa   :  { %p401_p3 = por %p400_p2, %p399_p1 }
   0xb   :  { %142 = vperm.xlu1 %393, %v134_v12  }
   0xc   :  { %235 = vperm.xlu0 %392, %v232_v9   ;;  %p402_p4 = pnand %p401_p3, %p395_p0 }
  0x83   :  { %v36_v13 = vpop.permute.xlu0 %35 }
  0x86   :  { %v138_v25 = vpop.permute.xlu1 %137 }
  0x87   :  { %v41_v14 = vpop.permute.xlu0 %40 }
  0x8a   :  { %v143_v26 = vpop.permute.xlu1 %142 }
  0x8b   :  { %v236_v35 = vpop.permute.xlu0 %235 }
  0xdb   :  { %v355_v15 = vpop.f32.mrb[0].mxu0 }
  0xdc   :  { %v126_v16 = vadd.f32 %v355_v15, %v41_v14  ;;  %v120_v17 = vpop.f32.mrb[1].mxu0 }
  0xdd   :  { %v121_v18 = vadd.f32 %v120_v17, %v36_v13 }
  0xde   :  { %v130_v19 = vmax.f32 %v126_v16, 0.0 }
  0xdf   :  { %v129_v20 = vmax.f32 %v121_v18, 0.0 }
  0xe1   :  { %v376_v21 = vpack.c.bf16 %v130_v19, %v129_v20 }
  0xe3   :  { %378 = vmatprep.subr.msk.bf16.mxu1 %vm473_vm2, %v376_v21 }
  0xe4   :  { %381 = vmatpush3.bf16.msk.msra.mxu1 %vm473_vm2, %v376_v21 }
  0xe7   :  { %361 = vmatmul.mubr.msk.f32.vlgmr.msra.gmra.mrb[0].mxu1 %vm43_vm3, %v132_v22 }
 0x1ba   :  { %v362_v27 = vpop.f32.mrb[0].mxu1 }
 0x1bb   :  { %v226_v28 = vadd.f32 %v362_v27, %v143_v26  ;;  %v220_v29 = vpop.f32.mrb[1].mxu1 }
 0x1bc   :  { %v221_v30 = vadd.f32 %v220_v29, %v138_v25 }
 0x1bd   :  { %v230_v31 = vmax.f32 %v226_v28, 0.0 }
 0x1be   :  { %v229_v32 = vmax.f32 %v221_v30, 0.0 }
 0x1c0   :  { %v383_v33 = vpack.c.bf16 %v230_v31, %v229_v32 }
 0x1c2   :  { %385 = vmatpush3.bf16.msk.msra.mxu0 %vm473_vm2, %v383_v33 }
 0x1c5   :  { %368 = vmatmul.mubr.msk.f32.vlgmr.msra.gmra.mrb[2].mxu0 %vm43_vm3, %v231_v34 }
 0x298   :  { %v310_v36 = vpop.f32.mrb[2].mxu0 }
 0x299   :  { %v311_v37 = vadd.f32 %v310_v36, %v236_v35  ;;  %v369_v38 = vpop.f32.mrb[3].mxu0 }
 0x29b   :  { %315 = vst.msk [vmem:[#allocation2] sm:$0xf] %vm314_vm5, %v311_v37 }
 0x29c   :  { %405 = shalt.err (!%p402_p4)
}
 0x29d   :  { %s406_s23 = scalar_lea.hbm %s538_s7, 64 }
 0x29e   :  { %p407_p5 = scmp.ne.s32.totalorder %s538_s7, %s406_s23  ;;  %p410_p6 = scmp.lt.u32.totalorder %s406_s23, %s538_s7 }
 0x2a0   :  { %p412_p7 = pnand %p410_p6, %p407_p5 }
 0x2a2   :  { %415 = shalt.err (!%p412_p7)
}
 0x2a3   :  { %325 = dma.vmem_to_hbm [thread:$0]  %s323_s20, 64, %s538_s7, [#allocation3]  }
 0x2a4   :  { %416 = dma.done.wait [#allocation3], 64  }
 0x2a5   :  { %417 = vsyncadd [#allocation3], 4294967232 }
 0x2a6   :  { %329 = vsyncpa [#allocation3], 1 }

</bundles_post_ra>
